<compile_context>
chip_gen: v7x
topology: tpu7x:2x2x1
jax: 0.10.0
libtpu: 0.0.40
codegen_flags: <defaults>
</compile_context>

<pallas_src>
import functools

import jax
import jax.numpy as jnp
from jax import lax
from jax.experimental import pallas as pl
from jax.experimental.pallas import tpu as pltpu


# ----------------------------------------------------------------------------
# Pallas kernel: fused input projection + forward recurrence + backward single
# step + fc1/ReLU + fused (BN-folded) heads.  Single grid point; everything is
# a few KB, resident in VMEM.
# ----------------------------------------------------------------------------
def _energy_kernel(x_ref,      # (T*B, I)   time-major flattened input
                   wih_ref,    # (I, 8H)    [Wih_fwd^T | Wih_bwd^T], g-gate cols pre-scaled by 2
                   bcat_ref,   # (1, 8H)    [b_fwd | b_bwd] (ih+hh), g-gate entries pre-scaled by 2
                   whh_ref,    # (H, 4H)    forward W_hh^T, g-gate cols pre-scaled by 2
                   w1f_ref,    # (H, H)     fc1 W^T, forward-feature half
                   w1b_ref,    # (H, H)     fc1 W^T, backward-feature half
                   b1_ref,     # (1, H)     fc1 bias
                   w2_ref,     # (H, 2)     [fc2_mean | fc2_variance] W^T, BN folded in
                   b2_ref,     # (1, 2)     [fc2_mean | fc2_variance] bias, BN folded in
                   out_ref):   # (B, 2)     [mean | softplus(variance)]
    B = out_ref.shape[0]
    TB = x_ref.shape[0]
    T = TB // B
    H = whh_ref.shape[0]

    whh = whh_ref[...]

    # One MXU matmul covers the input projection for EVERY timestep of BOTH
    # directions (forward needs all t; backward only needs t = T-1, but the extra
    # lanes are free filler on an otherwise idle MXU).  Bias added once, full width.
    xg = jnp.dot(x_ref[...], wih_ref[...],
                 preferred_element_type=jnp.float32) + bcat_ref[...]     # (T*B, 8H)

    h = jnp.zeros((B, H), jnp.float32)
    c = jnp.zeros((B, H), jnp.float32)

    # T is small and static: Python-level unroll => static slices, adjacent steps
    # interleave in the LLO scheduler.  Only h @ W_hh stays on the serial path.
    for t in range(T):
        gates = xg[t * B:(t + 1) * B, 0:4 * H] + jnp.dot(
            h, whh, preferred_element_type=jnp.float32)                  # (B, 4H)
        # Single full-width transcendental: g-gate pre-activations were pre-scaled
        # by 2 in the weights, so tanh(z) = 2*sigmoid(2z) - 1 comes out of the same
        # sigmoid pass with a cheap VPU affine.
        sig = jax.nn.sigmoid(gates)
        i_g = sig[:, 0 * H:1 * H]
        f_g = sig[:, 1 * H:2 * H]
        g_g = 2.0 * sig[:, 2 * H:3 * H] - 1.0
        o_g = sig[:, 3 * H:4 * H]
        c = f_g * c + i_g * g_g
        h = o_g * jnp.tanh(c)

    # Backward direction: lstm_out[:, -1, :] uses the backward output at the LAST
    # time index, which is exactly one backward-LSTM step on x[T-1] from a zero
    # hidden/cell state (the W_hh term vanishes).
    gb = xg[(T - 1) * B:T * B, 4 * H:8 * H]                               # (B, 4H)
    sigb = jax.nn.sigmoid(gb)
    cb = sigb[:, 0 * H:1 * H] * (2.0 * sigb[:, 2 * H:3 * H] - 1.0)        # i * g  (f*c0 = 0)
    h_bwd = sigb[:, 3 * H:4 * H] * jnp.tanh(cb)                           # o * tanh(c)

    # fc1 + ReLU.  w1 is pre-split so no cross-lane concat of h / h_bwd.
    y = (jnp.dot(h, w1f_ref[...], preferred_element_type=jnp.float32)
         + jnp.dot(h_bwd, w1b_ref[...], preferred_element_type=jnp.float32)
         + b1_ref[...])
    y = jnp.maximum(y, 0.0)

    # BatchNorm1d (eval) is folded into w2/b2 in make_params; Dropout is identity.
    # Fused heads: one (H, 2) matmul, one store.  Softplus applies only to the
    # variance column -> lane-index mask select.
    heads = jnp.dot(y, w2_ref[...], preferred_element_type=jnp.float32) + b2_ref[...]
    col = lax.broadcasted_iota(jnp.int32, heads.shape, 1)
    out_ref[...] = jnp.where(col == 1, jax.nn.softplus(heads), heads)


# ----------------------------------------------------------------------------
# Wrapper
# ----------------------------------------------------------------------------
@functools.partial(jax.jit, static_argnames=())
def energy_model_forward(x, params):
    """x: (B, T, I) float32 (PyTorch batch_first layout). Returns (mean, var), each (B, 1)."""
    B, T, I = x.shape
    x = x.astype(jnp.float32)

    # Time-major flatten is a pure layout op (no wrapper matmul, no HBM gate tensor).
    x_tm = jnp.transpose(x, (1, 0, 2)).reshape(T * B, I)

    vmem = pl.BlockSpec(memory_space=pltpu.MemorySpace.VMEM)
    args = (x_tm, params["wih"], params["bcat"], params["whhf"],
            params["w1f"], params["w1b"], params["b1"],
            params["w2"], params["b2"])

    # NOTE: at toy sizes a single gridless point on one TensorCore is optimal.  If B
    # is scaled up (and made a multiple of 8 for full sublane occupancy), add a batch
    # grid axis with dimension_semantics=("parallel",) so v7x's two TensorCores split
    # the batch, and re-derive the resident gate budget against 64 MiB VMEM (v7x)
    # before growing T*B*8H.  bf16 weights/activations (f32 accum) are worthwhile on
    # v6e/v7x at scale, not on v5e.
    out = pl.pallas_call(
        _energy_kernel,
        out_shape=jax.ShapeDtypeStruct((B, 2), jnp.float32),
        in_specs=[vmem] * len(args),
        out_specs=vmem,
    )(*args)
    return out[:, 0:1], out[:, 1:2]


# ----------------------------------------------------------------------------
# Deterministic parameter construction (same shapes as the PyTorch module).
# Eval-mode BatchNorm (running_mean=0, running_var=1, gamma=1, beta=0, eps=1e-5)
# is folded into the fused head weights; the g-gate 2x (tanh-via-sigmoid) is
# folded into the LSTM weights here.
# ----------------------------------------------------------------------------
def make_params(key, input_size, hidden_size):
    H, I = hidden_size, input_size
    k = jax.random.split(key, 12)
    s = 1.0 / jnp.sqrt(H)

    def u(kk, shape):
        return jax.random.uniform(kk, shape, jnp.float32, -s, s)

    # LSTM (layer 0, both directions). PyTorch layout: W_ih (4H, I), W_hh (4H, H),
    # gate order [i, f, g, o].
    wih_f, whh_f = u(k[0], (4 * H, I)), u(k[1], (4 * H, H))
    bih_f, bhh_f = u(k[2], (4 * H,)), u(k[3], (4 * H,))
    wih_b, whh_b = u(k[4], (4 * H, I)), u(k[5], (4 * H, H))
    bih_b, bhh_b = u(k[6], (4 * H,)), u(k[7], (4 * H,))
    # fc1: (H, 2H); heads: (1, H) each.
    w1, b1 = u(k[8], (H, 2 * H)), u(k[9], (H,))
    wm, bm = u(k[10], (1, H)), jnp.zeros((1,), jnp.float32)
    wv, bv = u(k[11], (1, H)), jnp.float32(0.1) * jnp.ones((1,), jnp.float32)

    # --- fold 2x into the g-gate rows so the kernel needs only one sigmoid pass ---
    gsl = slice(2 * H, 3 * H)
    bf = bih_f + bhh_f
    bb = bih_b + bhh_b
    wih_f2 = wih_f.at[gsl].multiply(2.0)
    whh_f2 = whh_f.at[gsl].multiply(2.0)
    bf2 = bf.at[gsl].multiply(2.0)
    wih_b2 = wih_b.at[gsl].multiply(2.0)
    bb2 = bb.at[gsl].multiply(2.0)

    # --- BatchNorm1d eval-mode affine, folded into the fused heads ---
    eps = 1e-5
    gamma = jnp.ones((H,), jnp.float32)
    beta = jnp.zeros((H,), jnp.float32)
    rmean = jnp.zeros((H,), jnp.float32)
    rvar = jnp.ones((H,), jnp.float32)
    scale = gamma * lax.rsqrt(rvar + eps)
    shift = beta - rmean * scale

    w2_raw = jnp.concatenate([wm.T, wv.T], axis=1)        # (H, 2)
    b2_raw = jnp.concatenate([bm, bv])[None, :]           # (1, 2)
    w2 = scale[:, None] * w2_raw                          # BN scale folded
    b2 = shift[None, :] @ w2_raw + b2_raw                 # BN shift folded

    params = dict(
        wih=jnp.concatenate([wih_f2.T, wih_b2.T], axis=1),   # (I, 8H) lane-dense
        bcat=jnp.concatenate([bf2, bb2])[None, :],            # (1, 8H)
        whhf=whh_f2.T,                                         # (H, 4H)
        w1f=w1[:, :H].T, w1b=w1[:, H:].T,                      # (H, H) each
        b1=b1[None, :],
        w2=w2, b2=b2,
    )
    # Keep raw (PyTorch-layout, un-folded) copies for the pure-JAX reference.
    raw = dict(wih_f=wih_f, whh_f=whh_f, bih_f=bih_f, bhh_f=bhh_f,
               wih_b=wih_b, bih_b=bih_b, bhh_b=bhh_b,
               w1=w1, b1=b1, wm=wm, bm=bm, wv=wv, bv=bv)
    return params, raw


# ----------------------------------------------------------------------------
# Pure-JAX reference (mirrors PyTorch eval-mode forward) for a sanity check.
# ----------------------------------------------------------------------------
def reference_forward(x, raw, hidden_size):
    H = hidden_size
    B, T, _ = x.shape

    def cell(xt, h, c, wih, whh, bih, bhh):
        g = xt @ wih.T + h @ whh.T + bih + bhh
        i = jax.nn.sigmoid(g[:, :H])
        f = jax.nn.sigmoid(g[:, H:2 * H])
        gg = jnp.tanh(g[:, 2 * H:3 * H])
        o = jax.nn.sigmoid(g[:, 3 * H:])
        c = f * c + i * gg
        return o * jnp.tanh(c), c

    h = c = jnp.zeros((B, H), jnp.float32)
    for t in range(T):
        h, c = cell(x[:, t, :], h, c, raw["wih_f"], raw["whh_f"],
                    raw["bih_f"], raw["bhh_f"])
    hb, _ = cell(x[:, T - 1, :], jnp.zeros((B, H)), jnp.zeros((B, H)),
                 raw["wih_b"], jnp.zeros((4 * H, H)), raw["bih_b"], raw["bhh_b"])
    feat = jnp.concatenate([h, hb], axis=-1)
    y = jnp.maximum(feat @ raw["w1"].T + raw["b1"], 0.0)
    y = y / jnp.sqrt(1.0 + 1e-5)       # BN eval: running mean 0, var 1, gamma 1, beta 0
    mean = y @ raw["wm"].T + raw["bm"]
    v = y @ raw["wv"].T + raw["bv"]
    var = jax.nn.softplus(v)
    return mean, var


if __name__ == "__main__":
    B, T, I, H = 4, 8, 16, 32
    key = jax.random.PRNGKey(0)
    kx, kp = jax.random.split(key)
    x = jax.random.normal(kx, (B, T, I), jnp.float32)
    params, raw = make_params(kp, I, H)

    mean, var = energy_model_forward(x, params)
    jax.block_until_ready((mean, var))

    ref_mean, ref_var = reference_forward(x, raw, H)
    assert mean.shape == (B, 1) and var.shape == (B, 1)
    assert jnp.allclose(mean, ref_mean, atol=1e-4), (mean, ref_mean)
    assert jnp.allclose(var, ref_var, atol=1e-4), (var, ref_var)
    assert bool(jnp.all(var > 0.0))

    print("KERNEL_OK")
</pallas_src>

<mosaic_0001>
module attributes {stable_mosaic.version = 11 : i64} {
  func.func @_energy_kernel(%arg0: memref<32x16xf32, #tpu.memory_space<vmem>>, %arg1: memref<16x256xf32, #tpu.memory_space<vmem>>, %arg2: memref<1x256xf32, #tpu.memory_space<vmem>>, %arg3: memref<32x128xf32, #tpu.memory_space<vmem>>, %arg4: memref<32x32xf32, #tpu.memory_space<vmem>>, %arg5: memref<32x32xf32, #tpu.memory_space<vmem>>, %arg6: memref<1x32xf32, #tpu.memory_space<vmem>>, %arg7: memref<32x2xf32, #tpu.memory_space<vmem>>, %arg8: memref<1x2xf32, #tpu.memory_space<vmem>>, %arg9: memref<4x2xf32, #tpu.memory_space<vmem>>) attributes {dimension_semantics = [], scalar_prefetch = 0 : i64, scratch_operands = 0 : i64, tpu.core_type = #tpu.core_type<tc>} {
    %c0 = arith.constant 0 : index
    %c0_0 = arith.constant 0 : index
    %0 = vector.load %arg3[%c0, %c0_0] : memref<32x128xf32, #tpu.memory_space<vmem>>, vector<32x128xf32>
    %c0_1 = arith.constant 0 : index
    %c0_2 = arith.constant 0 : index
    %1 = vector.load %arg0[%c0_1, %c0_2] : memref<32x16xf32, #tpu.memory_space<vmem>>, vector<32x16xf32>
    %c0_3 = arith.constant 0 : index
    %c0_4 = arith.constant 0 : index
    %2 = vector.load %arg1[%c0_3, %c0_4] : memref<16x256xf32, #tpu.memory_space<vmem>>, vector<16x256xf32>
    %cst = arith.constant dense<0.000000e+00> : vector<32x256xf32>
    %3 = tpu.matmul %1, %2, %cst {dimension_numbers = #tpu.dot_dimension_numbers<[1], [0], [0], [1], [0, 0, 1, 1], [], []>} : vector<32x16xf32>, vector<16x256xf32>, vector<32x256xf32> -> vector<32x256xf32>
    %c0_5 = arith.constant 0 : index
    %c0_6 = arith.constant 0 : index
    %4 = vector.load %arg2[%c0_5, %c0_6] : memref<1x256xf32, #tpu.memory_space<vmem>>, vector<1x256xf32>
    %5 = vector.broadcast %4 : vector<1x256xf32> to vector<32x256xf32>
    %6 = arith.addf %3, %5 : vector<32x256xf32>
    %cst_7 = arith.constant 0.000000e+00 : f32
    %7 = vector.broadcast %cst_7 : f32 to vector<4x32xf32>
    %cst_8 = arith.constant 0.000000e+00 : f32
    %8 = vector.broadcast %cst_8 : f32 to vector<4x32xf32>
    %9 = vector.extract_strided_slice %6 {offsets = [0, 0], sizes = [4, 128], strides = [1, 1]} : vector<32x256xf32> to vector<4x128xf32>
    %cst_9 = arith.constant dense<0.000000e+00> : vector<4x128xf32>
    %10 = tpu.matmul %7, %0, %cst_9 {dimension_numbers = #tpu.dot_dimension_numbers<[1], [0], [0], [1], [0, 0, 1, 1], [], []>} : vector<4x32xf32>, vector<32x128xf32>, vector<4x128xf32> -> vector<4x128xf32>
    %11 = arith.addf %9, %10 : vector<4x128xf32>
    %12 = arith.negf %11 : vector<4x128xf32>
    %13 = math.exp %12 : vector<4x128xf32>
    %cst_10 = arith.constant 1.000000e+00 : f32
    %14 = vector.broadcast %cst_10 : f32 to vector<4x128xf32>
    %15 = arith.addf %14, %13 : vector<4x128xf32>
    %16 = arith.divf %14, %15 : vector<4x128xf32>
    %17 = vector.extract_strided_slice %16 {offsets = [0, 0], sizes = [4, 32], strides = [1, 1]} : vector<4x128xf32> to vector<4x32xf32>
    %18 = vector.extract_strided_slice %16 {offsets = [0, 32], sizes = [4, 32], strides = [1, 1]} : vector<4x128xf32> to vector<4x32xf32>
    %19 = vector.extract_strided_slice %16 {offsets = [0, 64], sizes = [4, 32], strides = [1, 1]} : vector<4x128xf32> to vector<4x32xf32>
    %cst_11 = arith.constant 2.000000e+00 : f32
    %20 = vector.broadcast %cst_11 : f32 to vector<4x32xf32>
    %21 = arith.mulf %20, %19 : vector<4x32xf32>
    %cst_12 = arith.constant 1.000000e+00 : f32
    %22 = vector.broadcast %cst_12 : f32 to vector<4x32xf32>
    %23 = arith.subf %21, %22 : vector<4x32xf32>
    %24 = vector.extract_strided_slice %16 {offsets = [0, 96], sizes = [4, 32], strides = [1, 1]} : vector<4x128xf32> to vector<4x32xf32>
    %25 = arith.mulf %18, %8 : vector<4x32xf32>
    %26 = arith.mulf %17, %23 : vector<4x32xf32>
    %27 = arith.addf %25, %26 : vector<4x32xf32>
    %28 = math.tanh %27 : vector<4x32xf32>
    %29 = arith.mulf %24, %28 : vector<4x32xf32>
    %30 = vector.extract_strided_slice %6 {offsets = [4, 0], sizes = [4, 128], strides = [1, 1]} : vector<32x256xf32> to vector<4x128xf32>
    %cst_13 = arith.constant dense<0.000000e+00> : vector<4x128xf32>
    %31 = tpu.matmul %29, %0, %cst_13 {dimension_numbers = #tpu.dot_dimension_numbers<[1], [0], [0], [1], [0, 0, 1, 1], [], []>} : vector<4x32xf32>, vector<32x128xf32>, vector<4x128xf32> -> vector<4x128xf32>
    %32 = arith.addf %30, %31 : vector<4x128xf32>
    %33 = arith.negf %32 : vector<4x128xf32>
    %34 = math.exp %33 : vector<4x128xf32>
    %cst_14 = arith.constant 1.000000e+00 : f32
    %35 = vector.broadcast %cst_14 : f32 to vector<4x128xf32>
    %36 = arith.addf %35, %34 : vector<4x128xf32>
    %37 = arith.divf %35, %36 : vector<4x128xf32>
    %38 = vector.extract_strided_slice %37 {offsets = [0, 0], sizes = [4, 32], strides = [1, 1]} : vector<4x128xf32> to vector<4x32xf32>
    %39 = vector.extract_strided_slice %37 {offsets = [0, 32], sizes = [4, 32], strides = [1, 1]} : vector<4x128xf32> to vector<4x32xf32>
    %40 = vector.extract_strided_slice %37 {offsets = [0, 64], sizes = [4, 32], strides = [1, 1]} : vector<4x128xf32> to vector<4x32xf32>
    %cst_15 = arith.constant 2.000000e+00 : f32
    %41 = vector.broadcast %cst_15 : f32 to vector<4x32xf32>
    %42 = arith.mulf %41, %40 : vector<4x32xf32>
    %cst_16 = arith.constant 1.000000e+00 : f32
    %43 = vector.broadcast %cst_16 : f32 to vector<4x32xf32>
    %44 = arith.subf %42, %43 : vector<4x32xf32>
    %45 = vector.extract_strided_slice %37 {offsets = [0, 96], sizes = [4, 32], strides = [1, 1]} : vector<4x128xf32> to vector<4x32xf32>
    %46 = arith.mulf %39, %27 : vector<4x32xf32>
    %47 = arith.mulf %38, %44 : vector<4x32xf32>
    %48 = arith.addf %46, %47 : vector<4x32xf32>
    %49 = math.tanh %48 : vector<4x32xf32>
    %50 = arith.mulf %45, %49 : vector<4x32xf32>
    %51 = vector.extract_strided_slice %6 {offsets = [8, 0], sizes = [4, 128], strides = [1, 1]} : vector<32x256xf32> to vector<4x128xf32>
    %cst_17 = arith.constant dense<0.000000e+00> : vector<4x128xf32>
    %52 = tpu.matmul %50, %0, %cst_17 {dimension_numbers = #tpu.dot_dimension_numbers<[1], [0], [0], [1], [0, 0, 1, 1], [], []>} : vector<4x32xf32>, vector<32x128xf32>, vector<4x128xf32> -> vector<4x128xf32>
    %53 = arith.addf %51, %52 : vector<4x128xf32>
    %54 = arith.negf %53 : vector<4x128xf32>
    %55 = math.exp %54 : vector<4x128xf32>
    %cst_18 = arith.constant 1.000000e+00 : f32
    %56 = vector.broadcast %cst_18 : f32 to vector<4x128xf32>
    %57 = arith.addf %56, %55 : vector<4x128xf32>
    %58 = arith.divf %56, %57 : vector<4x128xf32>
    %59 = vector.extract_strided_slice %58 {offsets = [0, 0], sizes = [4, 32], strides = [1, 1]} : vector<4x128xf32> to vector<4x32xf32>
    %60 = vector.extract_strided_slice %58 {offsets = [0, 32], sizes = [4, 32], strides = [1, 1]} : vector<4x128xf32> to vector<4x32xf32>
    %61 = vector.extract_strided_slice %58 {offsets = [0, 64], sizes = [4, 32], strides = [1, 1]} : vector<4x128xf32> to vector<4x32xf32>
    %cst_19 = arith.constant 2.000000e+00 : f32
    %62 = vector.broadcast %cst_19 : f32 to vector<4x32xf32>
    %63 = arith.mulf %62, %61 : vector<4x32xf32>
    %cst_20 = arith.constant 1.000000e+00 : f32
    %64 = vector.broadcast %cst_20 : f32 to vector<4x32xf32>
    %65 = arith.subf %63, %64 : vector<4x32xf32>
    %66 = vector.extract_strided_slice %58 {offsets = [0, 96], sizes = [4, 32], strides = [1, 1]} : vector<4x128xf32> to vector<4x32xf32>
    %67 = arith.mulf %60, %48 : vector<4x32xf32>
    %68 = arith.mulf %59, %65 : vector<4x32xf32>
    %69 = arith.addf %67, %68 : vector<4x32xf32>
    %70 = math.tanh %69 : vector<4x32xf32>
    %71 = arith.mulf %66, %70 : vector<4x32xf32>
    %72 = vector.extract_strided_slice %6 {offsets = [12, 0], sizes = [4, 128], strides = [1, 1]} : vector<32x256xf32> to vector<4x128xf32>
    %cst_21 = arith.constant dense<0.000000e+00> : vector<4x128xf32>
    %73 = tpu.matmul %71, %0, %cst_21 {dimension_numbers = #tpu.dot_dimension_numbers<[1], [0], [0], [1], [0, 0, 1, 1], [], []>} : vector<4x32xf32>, vector<32x128xf32>, vector<4x128xf32> -> vector<4x128xf32>
    %74 = arith.addf %72, %73 : vector<4x128xf32>
    %75 = arith.negf %74 : vector<4x128xf32>
    %76 = math.exp %75 : vector<4x128xf32>
    %cst_22 = arith.constant 1.000000e+00 : f32
    %77 = vector.broadcast %cst_22 : f32 to vector<4x128xf32>
    %78 = arith.addf %77, %76 : vector<4x128xf32>
    %79 = arith.divf %77, %78 : vector<4x128xf32>
    %80 = vector.extract_strided_slice %79 {offsets = [0, 0], sizes = [4, 32], strides = [1, 1]} : vector<4x128xf32> to vector<4x32xf32>
    %81 = vector.extract_strided_slice %79 {offsets = [0, 32], sizes = [4, 32], strides = [1, 1]} : vector<4x128xf32> to vector<4x32xf32>
    %82 = vector.extract_strided_slice %79 {offsets = [0, 64], sizes = [4, 32], strides = [1, 1]} : vector<4x128xf32> to vector<4x32xf32>
    %cst_23 = arith.constant 2.000000e+00 : f32
    %83 = vector.broadcast %cst_23 : f32 to vector<4x32xf32>
    %84 = arith.mulf %83, %82 : vector<4x32xf32>
    %cst_24 = arith.constant 1.000000e+00 : f32
    %85 = vector.broadcast %cst_24 : f32 to vector<4x32xf32>
    %86 = arith.subf %84, %85 : vector<4x32xf32>
    %87 = vector.extract_strided_slice %79 {offsets = [0, 96], sizes = [4, 32], strides = [1, 1]} : vector<4x128xf32> to vector<4x32xf32>
    %88 = arith.mulf %81, %69 : vector<4x32xf32>
    %89 = arith.mulf %80, %86 : vector<4x32xf32>
    %90 = arith.addf %88, %89 : vector<4x32xf32>
    %91 = math.tanh %90 : vector<4x32xf32>
    %92 = arith.mulf %87, %91 : vector<4x32xf32>
    %93 = vector.extract_strided_slice %6 {offsets = [16, 0], sizes = [4, 128], strides = [1, 1]} : vector<32x256xf32> to vector<4x128xf32>
    %cst_25 = arith.constant dense<0.000000e+00> : vector<4x128xf32>
    %94 = tpu.matmul %92, %0, %cst_25 {dimension_numbers = #tpu.dot_dimension_numbers<[1], [0], [0], [1], [0, 0, 1, 1], [], []>} : vector<4x32xf32>, vector<32x128xf32>, vector<4x128xf32> -> vector<4x128xf32>
    %95 = arith.addf %93, %94 : vector<4x128xf32>
    %96 = arith.negf %95 : vector<4x128xf32>
    %97 = math.exp %96 : vector<4x128xf32>
    %cst_26 = arith.constant 1.000000e+00 : f32
    %98 = vector.broadcast %cst_26 : f32 to vector<4x128xf32>
    %99 = arith.addf %98, %97 : vector<4x128xf32>
    %100 = arith.divf %98, %99 : vector<4x128xf32>
    %101 = vector.extract_strided_slice %100 {offsets = [0, 0], sizes = [4, 32], strides = [1, 1]} : vector<4x128xf32> to vector<4x32xf32>
    %102 = vector.extract_strided_slice %100 {offsets = [0, 32], sizes = [4, 32], strides = [1, 1]} : vector<4x128xf32> to vector<4x32xf32>
    %103 = vector.extract_strided_slice %100 {offsets = [0, 64], sizes = [4, 32], strides = [1, 1]} : vector<4x128xf32> to vector<4x32xf32>
    %cst_27 = arith.constant 2.000000e+00 : f32
    %104 = vector.broadcast %cst_27 : f32 to vector<4x32xf32>
    %105 = arith.mulf %104, %103 : vector<4x32xf32>
    %cst_28 = arith.constant 1.000000e+00 : f32
    %106 = vector.broadcast %cst_28 : f32 to vector<4x32xf32>
    %107 = arith.subf %105, %106 : vector<4x32xf32>
    %108 = vector.extract_strided_slice %100 {offsets = [0, 96], sizes = [4, 32], strides = [1, 1]} : vector<4x128xf32> to vector<4x32xf32>
    %109 = arith.mulf %102, %90 : vector<4x32xf32>
    %110 = arith.mulf %101, %107 : vector<4x32xf32>
    %111 = arith.addf %109, %110 : vector<4x32xf32>
    %112 = math.tanh %111 : vector<4x32xf32>
    %113 = arith.mulf %108, %112 : vector<4x32xf32>
    %114 = vector.extract_strided_slice %6 {offsets = [20, 0], sizes = [4, 128], strides = [1, 1]} : vector<32x256xf32> to vector<4x128xf32>
    %cst_29 = arith.constant dense<0.000000e+00> : vector<4x128xf32>
    %115 = tpu.matmul %113, %0, %cst_29 {dimension_numbers = #tpu.dot_dimension_numbers<[1], [0], [0], [1], [0, 0, 1, 1], [], []>} : vector<4x32xf32>, vector<32x128xf32>, vector<4x128xf32> -> vector<4x128xf32>
    %116 = arith.addf %114, %115 : vector<4x128xf32>
    %117 = arith.negf %116 : vector<4x128xf32>
    %118 = math.exp %117 : vector<4x128xf32>
    %cst_30 = arith.constant 1.000000e+00 : f32
    %119 = vector.broadcast %cst_30 : f32 to vector<4x128xf32>
    %120 = arith.addf %119, %118 : vector<4x128xf32>
    %121 = arith.divf %119, %120 : vector<4x128xf32>
    %122 = vector.extract_strided_slice %121 {offsets = [0, 0], sizes = [4, 32], strides = [1, 1]} : vector<4x128xf32> to vector<4x32xf32>
    %123 = vector.extract_strided_slice %121 {offsets = [0, 32], sizes = [4, 32], strides = [1, 1]} : vector<4x128xf32> to vector<4x32xf32>
    %124 = vector.extract_strided_slice %121 {offsets = [0, 64], sizes = [4, 32], strides = [1, 1]} : vector<4x128xf32> to vector<4x32xf32>
    %cst_31 = arith.constant 2.000000e+00 : f32
    %125 = vector.broadcast %cst_31 : f32 to vector<4x32xf32>
    %126 = arith.mulf %125, %124 : vector<4x32xf32>
    %cst_32 = arith.constant 1.000000e+00 : f32
    %127 = vector.broadcast %cst_32 : f32 to vector<4x32xf32>
    %128 = arith.subf %126, %127 : vector<4x32xf32>
    %129 = vector.extract_strided_slice %121 {offsets = [0, 96], sizes = [4, 32], strides = [1, 1]} : vector<4x128xf32> to vector<4x32xf32>
    %130 = arith.mulf %123, %111 : vector<4x32xf32>
    %131 = arith.mulf %122, %128 : vector<4x32xf32>
    %132 = arith.addf %130, %131 : vector<4x32xf32>
    %133 = math.tanh %132 : vector<4x32xf32>
    %134 = arith.mulf %129, %133 : vector<4x32xf32>
    %135 = vector.extract_strided_slice %6 {offsets = [24, 0], sizes = [4, 128], strides = [1, 1]} : vector<32x256xf32> to vector<4x128xf32>
    %cst_33 = arith.constant dense<0.000000e+00> : vector<4x128xf32>
    %136 = tpu.matmul %134, %0, %cst_33 {dimension_numbers = #tpu.dot_dimension_numbers<[1], [0], [0], [1], [0, 0, 1, 1], [], []>} : vector<4x32xf32>, vector<32x128xf32>, vector<4x128xf32> -> vector<4x128xf32>
    %137 = arith.addf %135, %136 : vector<4x128xf32>
    %138 = arith.negf %137 : vector<4x128xf32>
    %139 = math.exp %138 : vector<4x128xf32>
    %cst_34 = arith.constant 1.000000e+00 : f32
    %140 = vector.broadcast %cst_34 : f32 to vector<4x128xf32>
    %141 = arith.addf %140, %139 : vector<4x128xf32>
    %142 = arith.divf %140, %141 : vector<4x128xf32>
    %143 = vector.extract_strided_slice %142 {offsets = [0, 0], sizes = [4, 32], strides = [1, 1]} : vector<4x128xf32> to vector<4x32xf32>
    %144 = vector.extract_strided_slice %142 {offsets = [0, 32], sizes = [4, 32], strides = [1, 1]} : vector<4x128xf32> to vector<4x32xf32>
    %145 = vector.extract_strided_slice %142 {offsets = [0, 64], sizes = [4, 32], strides = [1, 1]} : vector<4x128xf32> to vector<4x32xf32>
    %cst_35 = arith.constant 2.000000e+00 : f32
    %146 = vector.broadcast %cst_35 : f32 to vector<4x32xf32>
    %147 = arith.mulf %146, %145 : vector<4x32xf32>
    %cst_36 = arith.constant 1.000000e+00 : f32
    %148 = vector.broadcast %cst_36 : f32 to vector<4x32xf32>
    %149 = arith.subf %147, %148 : vector<4x32xf32>
    %150 = vector.extract_strided_slice %142 {offsets = [0, 96], sizes = [4, 32], strides = [1, 1]} : vector<4x128xf32> to vector<4x32xf32>
    %151 = arith.mulf %144, %132 : vector<4x32xf32>
    %152 = arith.mulf %143, %149 : vector<4x32xf32>
    %153 = arith.addf %151, %152 : vector<4x32xf32>
    %154 = math.tanh %153 : vector<4x32xf32>
    %155 = arith.mulf %150, %154 : vector<4x32xf32>
    %156 = vector.extract_strided_slice %6 {offsets = [28, 0], sizes = [4, 128], strides = [1, 1]} : vector<32x256xf32> to vector<4x128xf32>
    %cst_37 = arith.constant dense<0.000000e+00> : vector<4x128xf32>
    %157 = tpu.matmul %155, %0, %cst_37 {dimension_numbers = #tpu.dot_dimension_numbers<[1], [0], [0], [1], [0, 0, 1, 1], [], []>} : vector<4x32xf32>, vector<32x128xf32>, vector<4x128xf32> -> vector<4x128xf32>
    %158 = arith.addf %156, %157 : vector<4x128xf32>
    %159 = arith.negf %158 : vector<4x128xf32>
    %160 = math.exp %159 : vector<4x128xf32>
    %cst_38 = arith.constant 1.000000e+00 : f32
    %161 = vector.broadcast %cst_38 : f32 to vector<4x128xf32>
    %162 = arith.addf %161, %160 : vector<4x128xf32>
    %163 = arith.divf %161, %162 : vector<4x128xf32>
    %164 = vector.extract_strided_slice %163 {offsets = [0, 0], sizes = [4, 32], strides = [1, 1]} : vector<4x128xf32> to vector<4x32xf32>
    %165 = vector.extract_strided_slice %163 {offsets = [0, 32], sizes = [4, 32], strides = [1, 1]} : vector<4x128xf32> to vector<4x32xf32>
    %166 = vector.extract_strided_slice %163 {offsets = [0, 64], sizes = [4, 32], strides = [1, 1]} : vector<4x128xf32> to vector<4x32xf32>
    %cst_39 = arith.constant 2.000000e+00 : f32
    %167 = vector.broadcast %cst_39 : f32 to vector<4x32xf32>
    %168 = arith.mulf %167, %166 : vector<4x32xf32>
    %cst_40 = arith.constant 1.000000e+00 : f32
    %169 = vector.broadcast %cst_40 : f32 to vector<4x32xf32>
    %170 = arith.subf %168, %169 : vector<4x32xf32>
    %171 = vector.extract_strided_slice %163 {offsets = [0, 96], sizes = [4, 32], strides = [1, 1]} : vector<4x128xf32> to vector<4x32xf32>
    %172 = arith.mulf %165, %153 : vector<4x32xf32>
    %173 = arith.mulf %164, %170 : vector<4x32xf32>
    %174 = arith.addf %172, %173 : vector<4x32xf32>
    %175 = math.tanh %174 : vector<4x32xf32>
    %176 = arith.mulf %171, %175 : vector<4x32xf32>
    %177 = vector.extract_strided_slice %6 {offsets = [28, 128], sizes = [4, 128], strides = [1, 1]} : vector<32x256xf32> to vector<4x128xf32>
    %178 = arith.negf %177 : vector<4x128xf32>
    %179 = math.exp %178 : vector<4x128xf32>
    %cst_41 = arith.constant 1.000000e+00 : f32
    %180 = vector.broadcast %cst_41 : f32 to vector<4x128xf32>
    %181 = arith.addf %180, %179 : vector<4x128xf32>
    %182 = arith.divf %180, %181 : vector<4x128xf32>
    %183 = vector.extract_strided_slice %182 {offsets = [0, 0], sizes = [4, 32], strides = [1, 1]} : vector<4x128xf32> to vector<4x32xf32>
    %184 = vector.extract_strided_slice %182 {offsets = [0, 64], sizes = [4, 32], strides = [1, 1]} : vector<4x128xf32> to vector<4x32xf32>
    %cst_42 = arith.constant 2.000000e+00 : f32
    %185 = vector.broadcast %cst_42 : f32 to vector<4x32xf32>
    %186 = arith.mulf %185, %184 : vector<4x32xf32>
    %cst_43 = arith.constant 1.000000e+00 : f32
    %187 = vector.broadcast %cst_43 : f32 to vector<4x32xf32>
    %188 = arith.subf %186, %187 : vector<4x32xf32>
    %189 = arith.mulf %183, %188 : vector<4x32xf32>
    %190 = vector.extract_strided_slice %182 {offsets = [0, 96], sizes = [4, 32], strides = [1, 1]} : vector<4x128xf32> to vector<4x32xf32>
    %191 = math.tanh %189 : vector<4x32xf32>
    %192 = arith.mulf %190, %191 : vector<4x32xf32>
    %c0_44 = arith.constant 0 : index
    %c0_45 = arith.constant 0 : index
    %193 = vector.load %arg4[%c0_44, %c0_45] : memref<32x32xf32, #tpu.memory_space<vmem>>, vector<32x32xf32>
    %cst_46 = arith.constant dense<0.000000e+00> : vector<4x32xf32>
    %194 = tpu.matmul %176, %193, %cst_46 {dimension_numbers = #tpu.dot_dimension_numbers<[1], [0], [0], [1], [0, 0, 1, 1], [], []>} : vector<4x32xf32>, vector<32x32xf32>, vector<4x32xf32> -> vector<4x32xf32>
    %c0_47 = arith.constant 0 : index
    %c0_48 = arith.constant 0 : index
    %195 = vector.load %arg5[%c0_47, %c0_48] : memref<32x32xf32, #tpu.memory_space<vmem>>, vector<32x32xf32>
    %cst_49 = arith.constant dense<0.000000e+00> : vector<4x32xf32>
    %196 = tpu.matmul %192, %195, %cst_49 {dimension_numbers = #tpu.dot_dimension_numbers<[1], [0], [0], [1], [0, 0, 1, 1], [], []>} : vector<4x32xf32>, vector<32x32xf32>, vector<4x32xf32> -> vector<4x32xf32>
    %197 = arith.addf %194, %196 : vector<4x32xf32>
    %c0_50 = arith.constant 0 : index
    %c0_51 = arith.constant 0 : index
    %198 = vector.load %arg6[%c0_50, %c0_51] : memref<1x32xf32, #tpu.memory_space<vmem>>, vector<1x32xf32>
    %199 = vector.broadcast %198 : vector<1x32xf32> to vector<4x32xf32>
    %200 = arith.addf %197, %199 : vector<4x32xf32>
    %cst_52 = arith.constant 0.000000e+00 : f32
    %201 = vector.broadcast %cst_52 : f32 to vector<4x32xf32>
    %202 = arith.maximumf %200, %201 : vector<4x32xf32>
    %c0_53 = arith.constant 0 : index
    %c0_54 = arith.constant 0 : index
    %203 = vector.load %arg7[%c0_53, %c0_54] : memref<32x2xf32, #tpu.memory_space<vmem>>, vector<32x2xf32>
    %cst_55 = arith.constant dense<0.000000e+00> : vector<4x2xf32>
    %204 = tpu.matmul %202, %203, %cst_55 {dimension_numbers = #tpu.dot_dimension_numbers<[1], [0], [0], [1], [0, 0, 1, 1], [], []>} : vector<4x32xf32>, vector<32x2xf32>, vector<4x2xf32> -> vector<4x2xf32>
    %c0_56 = arith.constant 0 : index
    %c0_57 = arith.constant 0 : index
    %205 = vector.load %arg8[%c0_56, %c0_57] : memref<1x2xf32, #tpu.memory_space<vmem>>, vector<1x2xf32>
    %206 = vector.broadcast %205 : vector<1x2xf32> to vector<4x2xf32>
    %207 = arith.addf %204, %206 : vector<4x2xf32>
    %208 = tpu.iota {dimensions = array<i32: 1>} : vector<4x2xi32>
    %c1_i32 = arith.constant 1 : i32
    %209 = vector.broadcast %c1_i32 : i32 to vector<4x2xi32>
    %210 = arith.cmpi eq, %208, %209 : vector<4x2xi32>
    %cst_58 = arith.constant 0.000000e+00 : f32
    %211 = vector.broadcast %cst_58 : f32 to vector<4x2xf32>
    %212 = arith.maximumf %207, %211 : vector<4x2xf32>
    %213 = vector.broadcast %cst_58 : f32 to vector<4x2xf32>
    %214 = arith.subf %207, %213 : vector<4x2xf32>
    %215 = arith.cmpf one, %214, %214 : vector<4x2xf32>
    %216 = vector.broadcast %cst_58 : f32 to vector<4x2xf32>
    %217 = arith.addf %207, %216 : vector<4x2xf32>
    %218 = math.absf %214 : vector<4x2xf32>
    %cst_59 = arith.constant 0.000000e+00 : f32
    %219 = vector.broadcast %cst_59 : f32 to vector<4x2xf32>
    %220 = arith.subf %219, %218 : vector<4x2xf32>
    %221 = math.exp %220 : vector<4x2xf32>
    %222 = math.log1p %221 : vector<4x2xf32>
    %223 = arith.addf %212, %222 : vector<4x2xf32>
    %224 = arith.select %215, %217, %223 : vector<4x2xi1>, vector<4x2xf32>
    %225 = arith.select %210, %224, %207 : vector<4x2xi1>, vector<4x2xf32>
    %c0_60 = arith.constant 0 : index
    %c0_61 = arith.constant 0 : index
    %226 = vector.load %arg9[%c0_60, %c0_61] : memref<4x2xf32, #tpu.memory_space<vmem>>, vector<4x2xf32>
    tpu.vector_store %arg9[%c0_60, %c0_61], %225 {strides = array<i32>} : memref<4x2xf32, #tpu.memory_space<vmem>>, vector<4x2xf32>,
    return
  }
}

</mosaic_0001>

<bundles_post_ra>
// kernel: energy_model_forward.1
= control target key start
LH: loop header
LB: loop body
LE: loop exit
PB: predicated region body
PF: predicated region fallthrough
CT: control target
= control target key end

     0   :  { %14 = vsyncpa [#allocation3], 0  ;;  %s1684_s30 = smov [#allocation2]   ;;  %s1969_s0 = inlined_call_operand.vmem [shape: f32[32,16], index: 0, kind: input, shape index: {}]   ;;  %s1970_s1 = inlined_call_operand.vmem [shape: f32[16,256], index: 1, kind: input, shape index: {}]   ;;  %s1971_s2 = inlined_call_operand.vmem [shape: f32[1,256], index: 2, kind: input, shape index: {}]   ;;  %s1972_s3 = inlined_call_operand.vmem [shape: f32[32,128], index: 3, kind: input, shape index: {}]   ;;  %s1973_s4 = inlined_call_operand.vmem [shape: f32[32,32], index: 4, kind: input, shape index: {}]   ;;  %s1974_s5 = inlined_call_operand.hbm [shape: f32[32,32], index: 5, kind: input, shape index: {}]   ;;  %s1975_s6 = inlined_call_operand.vmem [shape: f32[1,32], index: 6, kind: input, shape index: {}]   ;;  %s1976_s7 = inlined_call_operand.vmem [shape: f32[32,2], index: 7, kind: input, shape index: {}]   ;;  %s1977_s8 = inlined_call_operand.vmem [shape: f32[1,2], index: 8, kind: input, shape index: {}]   ;;  %s1978_s9 = inlined_call_operand.vmem [shape: f32[4,2], index: 9, kind: output, shape index: {}]  }
   0x1   :  { %s30_s10 = sshll.u32 %s1684_s30, 4  ;;  %s1660_s13 = scalar_lea.hbm %s1974_s5, 512  ;;  %s31_s10 = int_to_ptr.vmem [resolvable:$true] %s30_s10 }
   0x2   :  { %p1661_p0 = scmp.ne.s32.totalorder %s1974_s5, %s1660_s13  ;;  %p1664_p1 = scmp.lt.u32.totalorder %s1660_s13, %s1974_s5 }
   0x4   :  { %p1666_p2 = pnand %p1664_p1, %p1661_p0 }
   0x6   :  { %1669 = shalt.err (!%p1666_p2)
}
   0x7   :  { %s1670_s18 = scalar_lea.vmem %s31_s10, 512  ;;  %p1675_p4 = scmp.lt.s32.totalorder %s31_s10, %s31_s10 }
   0x8   :  { %p1671_p3 = scmp.ne.s32.totalorder %s31_s10, %s1670_s18  ;;  %p1676_p5 = scmp.lt.s32.totalorder %s1670_s18, %s1670_s18 }
   0xa   :  { %p1677_p6 = por %p1676_p5, %p1675_p4 }
   0xc   :  { %p1678_p7 = pnand %p1677_p6, %p1671_p3 }
   0xe   :  { %1681 = shalt.err (!%p1678_p7)
}
   0xf   :  { %s1685_s19 = smov 128   ;;  %s1686_s20 = smov 8  }
  0x10   :  { %36 = dma.hbm_to_vmem [thread:$0]  %s1974_s5, 512, %s31_s10, [#allocation3], %s1685_s19, %s1685_s19, %s1686_s20  }
  0x11   :  { %1682 = dma.done.wait [#allocation3], 512  }
  0x12   :  { %1683 = vsyncadd [#allocation3], 4294966784  ;;  %v1687_v0 = vmov 0.0|0.0   ;;  %v1688_v1 = vmov 0.0   ;;  %vm1689_vm0 = vmmov 0   ;;  %v55_v2 = vld [vmem:[%s1970_s1 + $0x8] sm:$0xff]  ;;  %v60_v15 = vlaneseq }
  0x13   :  { %1527 = vmatprep.subr.bf16.mxu1 %v1687_v0  ;;  %147 = vmatprep.mubr.f32.mxu0 %v1688_v1  ;;  %v57_v3 = vld [vmem:[%s1970_s1 + $0x18] sm:$0xff]  ;;  %v46_v4 = vld [vmem:[%s1972_s3] sm:$0xff]  ;;  %v47_v6 = vld [vmem:[%s1972_s3 + $0x8] sm:$0xff]  ;;  %vm70_vm1 = vcmask 130048   ;;  %s1691_s19 = smov 32   ;;  %vm169_vm2 = vcmask 261120  }
  0x14   :  { %1410 = vmatprep.mubr.msk.f32.mxu1 %vm1689_vm0, %v1688_v1  ;;  %v1523_v5 = vpack.c.bf16 %v57_v3, %v55_v2  ;;  %v54_v7 = vld [vmem:[%s1970_s1] sm:$0xff]  ;;  %v56_v8 = vld [vmem:[%s1970_s1 + $0x10] sm:$0xff]  ;;  %v1777_v9 = vpack.c.bf16 %v47_v6, %v46_v4  ;;  %v49_v12 = vld [vmem:[%s1972_s3 + $0x18] sm:$0xff]  ;;  %v1809_v16 = vshrl.u32 %v60_v15, 7  ;;  %vm1306_vm6 = vcmask 11264  }
  0x15   :  { %v1525_v10 = vpack.c.bf16 %v56_v8, %v54_v7  ;;  %v48_v11 = vld [vmem:[%s1972_s3 + $0x10] sm:$0xff]  ;;  %v50_v13 = vld [vmem:[%s1969_s0] sm:$0xff]  ;;  %v51_v57 = vld [vmem:[%s1969_s0 + $0x8] sm:$0xff] }
  0x16   :  { %1524 = vmatprep.subr.bf16.mxu0 %v1523_v5  ;;  %1529 = vmatpush3.bf16.msra.mxu1 %v1777_v9  ;;  %v1789_v14 = vpack.c.bf16 %v49_v12, %v48_v11  ;;  %v62_v17 = vsub.s32 0, %v1809_v16  ;;  %v1815_v18 = vld [vmem:[%s1971_s2] sm:$0x3]  ;;  %s1690_s2 = smov 64   ;;  %v52_v58 = vld [vmem:[%s1969_s0 + $0x10] sm:$0xff]  ;;  %v53_v59 = vld [vmem:[%s1969_s0 + $0x18] sm:$0xff] }
  0x17   :  { %1526 = vmatpush1.bf16.msra.mxu0 %v1525_v10  ;;  %1530 = vmatprep.subr.bf16.mxu1 %v1687_v0  ;;  %s1692_s0 = smov 96  }
  0x18   :  { %1539 = vmatprep.subr.bf16.mxu0 %v1687_v0  ;;  %v1818_v19 = vrot.slane %v1815_v18, %v62_v17 }
  0x1a   :  { %1313 = vmatmul.mubr.msk.f32.vlgmr.msra.gmra.mrb[0].mxu0 %vm70_vm1, %v50_v13  ;;  %1532 = vmatpush3.bf16.msra.mxu1 %v1789_v14 }
  0x1b   :  { %1541 = vmatpush3.bf16.msra.mxu0 %v1777_v9  ;;  %1533 = vmatprep.subr.bf16.mxu1 %v1687_v0 }
  0x1c   :  { %152 = vmatprep.mubr.f32.mxu0 %v1688_v1  ;;  %1542 = vmatprep.subr.bf16.mxu0 %v1687_v0 }
  0x1d   :  { %1411 = vmatmul.mubr.f32.vlgmr.msra.gmra.mrb[0].mxu1 %v1688_v1 }
  0x1e   :  { %1535 = vmatpush3.bf16.msra.mxu1 %v1777_v9  ;;  %1421 = vmatprep.mubr.msk.f32.mxu1 %vm1689_vm0, %v1688_v1 }
  0x1f   :  { %1536 = vmatprep.subr.bf16.mxu1 %v1687_v0  ;;  %1544 = vmatpush3.bf16.msra.mxu0 %v1789_v14 }
  0x20   :  { %1551 = vmatprep.subr.bf16.mxu0 %v1687_v0  ;;  %1314 = vmatmul.mubr.msk.f32.gmra.mrb[2].mxu0 %vm70_vm1, %v51_v57 }
  0x21   :  { %157 = vmatprep.mubr.f32.mxu0 %v1688_v1 }
  0x22   :  { %1538 = vmatpush3.bf16.msra.mxu1 %v1789_v14 }
  0x23   :  { %1545 = vmatprep.subr.bf16.mxu1 %v1687_v0 }
  0x24   :  { %1315 = vmatmul.mubr.msk.f32.gmra.mrb[4].mxu0 %vm70_vm1, %v52_v58 }
  0x25   :  { %162 = vmatprep.mubr.f32.mxu0 %v1688_v1 }
  0x28   :  { %1316 = vmatmul.mubr.msk.f32.gmra.mrb[6].mxu0 %vm70_vm1, %v53_v59 }
  0x29   :  { %1432 = vmatprep.mubr.msk.f32.mxu0 %vm1689_vm0, %v1688_v1 }
  0xed   :  { %v149_v20 = vpop.f32.mrb[0].mxu0 }
  0xee   :  { %v150_v21 = vadd.f32 %v149_v20, %v1818_v19  ;;  %v151_v22 = vpop.f32.mrb[1].mxu0 }
  0xf0   :  { %v239_v23 = vpop.f32.mrb[0].mxu1 }
  0xf1   :  { %v243_v24 = vadd.f32 %v239_v23, %v150_v21  ;;  %v1412_v25 = vpop.f32.mrb[1].mxu1 }
  0xf3   :  { %v1317_v26 = vmul.f32 -1.442695, %v243_v24  ;;  %v154_v2 = vpop.f32.mrb[2].mxu0 }
  0xf4   :  { %v156_v3 = vpop.f32.mrb[3].mxu0  ;;  %v155_v10 = vadd.f32 %v154_v2, %v1818_v19 }
  0xf5   :  { %1602 = vpow2.f32 %v1317_v26 }
  0xf7   :  { %v1852_v4 = vpop.f32.mrb[4].mxu0 }
  0xf8   :  { %v161_v5 = vpop.f32.mrb[5].mxu0 }
  0xfb   :  { %v1854_v6 = vpop.f32.mrb[6].mxu0 }
  0xfc   :  { %v1856_v7 = vpop.f32.mrb[7].mxu0 }
  0xff   :  { %v1603_v27 = vpop.eup %1602 }
 0x100   :  { %v247_v28 = vadd.f32 1.0, %v1603_v27 }
 0x102   :  { %1604 = vrcp.f32 %v247_v28 }
 0x10c   :  { %v1605_v29 = vpop.eup %1604 }
 0x10d   :  { %v250_v30 = vmul.f32 2.0, %v1605_v29  ;;  %v252_v34 = vmul.f32 0.0, %v1605_v29 }
 0x10f   :  { %v1318_v31 = vadd.f32 -1.0, %v250_v30 }
 0x111   :  { %254 = vrot.lane.b32.xlu0 %v1318_v31, %s1690_s2 }
 0x183   :  { %v255_v32 = vpop.permute.xlu0 %254 }
 0x184   :  { %v257_v33 = vmul.f32 %v1605_v29, %v255_v32 }
 0x186   :  { %259 = vrot.lane.b32.xlu0 %v257_v33, %s1691_s19 }
 0x1f8   :  { %v260_v35 = vpop.permute.xlu0 %259 }
 0x1f9   :  { %v262_v36 = vadd.f32 %v260_v35, %v252_v34 }
 0x1fb   :  { %1606 = vtanh.f32 %v262_v36  ;;  %v357_v53 = vrot.slane %v262_v36, 4 }
 0x205   :  { %v1607_v37 = vpop.eup %1606 }
 0x206   :  { %265 = vrot.lane.b32.xlu1 %v1607_v37, %s1690_s2 }
 0x278   :  { %v266_v38 = vpop.permute.xlu1 %265 }
 0x279   :  { %v268_v39 = vmul.f32 %v1605_v29, %v266_v38 }
 0x27b   :  { %270 = vrot.lane.b32.xlu1 %v268_v39, %s1691_s19 }
 0x2ed   :  { %v271_v40 = vpop.permute.xlu1 %270 }
 0x2ee   :  { %1422 = vmatmul.mubr.msk.f32.vlgmr.msra.gmra.mrb[2].mxu1 %vm169_vm2, %v271_v40 }
 0x2ef   :  { %1547 = vmatpush3.bf16.msra.mxu1 %v1777_v9  ;;  %1443 = vmatprep.mubr.msk.f32.mxu1 %vm1689_vm0, %v1688_v1 }
 0x2f0   :  { %1548 = vmatprep.subr.bf16.mxu1 %v1687_v0 }
 0x2f3   :  { %1550 = vmatpush3.bf16.msra.mxu1 %v1789_v14 }
 0x2f4   :  { %1557 = vmatprep.subr.bf16.mxu1 %v1687_v0 }
 0x3c1   :  { %v340_v41 = vpop.f32.mrb[2].mxu1 }
 0x3c2   :  { %v345_v42 = vrot.slane %v340_v41, 4  ;;  %v1423_v43 = vpop.f32.mrb[3].mxu1 }
 0x3c4   :  { %v347_v44 = vadd.f32 %v345_v42, %v150_v21 }
 0x3c6   :  { %v1320_v45 = vmul.f32 -1.442695, %v347_v44 }
 0x3c8   :  { %1608 = vpow2.f32 %v1320_v45 }
 0x3d2   :  { %v1609_v46 = vpop.eup %1608 }
 0x3d3   :  { %v351_v47 = vadd.f32 1.0, %v1609_v46 }
 0x3d5   :  { %1610 = vrcp.f32 %v351_v47 }
 0x3df   :  { %v1611_v48 = vpop.eup %1610 }
 0x3e0   :  { %v354_v49 = vmul.f32 2.0, %v1611_v48  ;;  %v359_v54 = vmul.f32 %v1611_v48, %v357_v53 }
 0x3e2   :  { %v1321_v50 = vadd.f32 -1.0, %v354_v49 }
 0x3e4   :  { %361 = vrot.lane.b32.xlu0 %v1321_v50, %s1690_s2 }
 0x456   :  { %v362_v51 = vpop.permute.xlu0 %361 }
 0x457   :  { %v364_v52 = vmul.f32 %v1611_v48, %v362_v51 }
 0x459   :  { %366 = vrot.lane.b32.xlu1 %v364_v52, %s1691_s19 }
 0x4cb   :  { %v367_v55 = vpop.permute.xlu1 %366 }
 0x4cc   :  { %v369_v56 = vadd.f32 %v367_v55, %v359_v54 }
 0x4ce   :  { %1612 = vtanh.f32 %v369_v56  ;;  %v462_v27 = vrot.slane %v369_v56, 4  ;;  %v160_v56 = vadd.f32 %v1852_v4, %v1818_v19 }
 0x4d8   :  { %v1613_v60 = vpop.eup %1612 }
 0x4d9   :  { %372 = vrot.lane.b32.xlu0 %v1613_v60, %s1690_s2 }
 0x54b   :  { %v373_v61 = vpop.permute.xlu0 %372 }
 0x54c   :  { %v375_v62 = vmul.f32 %v1611_v48, %v373_v61 }
 0x54e   :  { %v377_v63 = vrot.slane %v375_v62, 4 }
 0x550   :  { %378 = vrot.lane.b32.xlu1 %v377_v63, %s1691_s19 }
 0x5c2   :  { %v379_v8 = vpop.permute.xlu1 %378 }
 0x5c3   :  { %1433 = vmatmul.mubr.msk.f32.vlgmr.msra.gmra.mrb[8].mxu0 %vm169_vm2, %v379_v8 }
 0x5c4   :  { %1553 = vmatpush3.bf16.msra.mxu0 %v1777_v9  ;;  %1454 = vmatprep.mubr.msk.f32.mxu0 %vm1689_vm0, %v1688_v1 }
 0x5c5   :  { %1554 = vmatprep.subr.bf16.mxu0 %v1687_v0 }
 0x5c8   :  { %1556 = vmatpush3.bf16.msra.mxu0 %v1789_v14 }
 0x5c9   :  { %1563 = vmatprep.subr.bf16.mxu0 %v1687_v0 }
 0x696   :  { %v448_v11 = vpop.f32.mrb[8].mxu0 }
 0x697   :  { %v452_v12 = vadd.f32 %v448_v11, %v155_v10  ;;  %v1434_v13 = vpop.f32.mrb[9].mxu0 }
 0x699   :  { %v1323_v17 = vmul.f32 -1.442695, %v452_v12 }
 0x69b   :  { %1614 = vpow2.f32 %v1323_v17 }
 0x6a5   :  { %v1615_v20 = vpop.eup %1614 }
 0x6a6   :  { %v456_v21 = vadd.f32 1.0, %v1615_v20 }
 0x6a8   :  { %1616 = vrcp.f32 %v456_v21 }
 0x6b2   :  { %v1617_v22 = vpop.eup %1616 }
 0x6b3   :  { %v459_v23 = vmul.f32 2.0, %v1617_v22  ;;  %v464_v28 = vmul.f32 %v1617_v22, %v462_v27 }
 0x6b5   :  { %v1324_v24 = vadd.f32 -1.0, %v459_v23 }
 0x6b7   :  { %466 = vrot.lane.b32.xlu0 %v1324_v24, %s1690_s2 }
 0x729   :  { %v467_v25 = vpop.permute.xlu0 %466 }
 0x72a   :  { %v469_v26 = vmul.f32 %v1617_v22, %v467_v25 }
 0x72c   :  { %471 = vrot.lane.b32.xlu1 %v469_v26, %s1691_s19 }
 0x79e   :  { %v472_v29 = vpop.permute.xlu1 %471 }
 0x79f   :  { %v474_v30 = vadd.f32 %v472_v29, %v464_v28 }
 0x7a1   :  { %1618 = vtanh.f32 %v474_v30  ;;  %v569_v47 = vrot.slane %v474_v30, 4 }
 0x7ab   :  { %v1619_v31 = vpop.eup %1618 }
 0x7ac   :  { %477 = vrot.lane.b32.xlu0 %v1619_v31, %s1690_s2 }
 0x81e   :  { %v478_v32 = vpop.permute.xlu0 %477 }
 0x81f   :  { %v480_v33 = vmul.f32 %v1617_v22, %v478_v32 }
 0x821   :  { %482 = vrot.lane.b32.xlu1 %v480_v33, %s1691_s19 }
 0x893   :  { %v483_v34 = vpop.permute.xlu1 %482 }
 0x894   :  { %1444 = vmatmul.mubr.msk.f32.vlgmr.msra.gmra.mrb[4].mxu1 %vm169_vm2, %v483_v34 }
 0x895   :  { %1559 = vmatpush3.bf16.msra.mxu1 %v1777_v9  ;;  %1465 = vmatprep.mubr.msk.f32.mxu1 %vm1689_vm0, %v1688_v1 }
 0x896   :  { %1560 = vmatprep.subr.bf16.mxu1 %v1687_v0 }
 0x899   :  { %1562 = vmatpush3.bf16.msra.mxu1 %v1789_v14 }
 0x89a   :  { %1569 = vmatprep.subr.bf16.mxu1 %v1687_v0 }
 0x967   :  { %v552_v35 = vpop.f32.mrb[4].mxu1 }
 0x968   :  { %v557_v36 = vrot.slane %v552_v35, 4  ;;  %v1445_v37 = vpop.f32.mrb[5].mxu1 }
 0x96a   :  { %v559_v38 = vadd.f32 %v557_v36, %v155_v10 }
 0x96c   :  { %v1326_v39 = vmul.f32 -1.442695, %v559_v38 }
 0x96e   :  { %1620 = vpow2.f32 %v1326_v39 }
 0x978   :  { %v1621_v40 = vpop.eup %1620 }
 0x979   :  { %v563_v41 = vadd.f32 1.0, %v1621_v40 }
 0x97b   :  { %1622 = vrcp.f32 %v563_v41  ;;  %v165_v41 = vadd.f32 %v1854_v6, %v1818_v19 }
 0x985   :  { %v1623_v42 = vpop.eup %1622 }
 0x986   :  { %v566_v43 = vmul.f32 2.0, %v1623_v42  ;;  %v571_v48 = vmul.f32 %v1623_v42, %v569_v47 }
 0x988   :  { %v1327_v44 = vadd.f32 -1.0, %v566_v43 }
 0x98a   :  { %573 = vrot.lane.b32.xlu0 %v1327_v44, %s1690_s2 }
 0x9fc   :  { %v574_v45 = vpop.permute.xlu0 %573 }
 0x9fd   :  { %v576_v46 = vmul.f32 %v1623_v42, %v574_v45 }
 0x9ff   :  { %578 = vrot.lane.b32.xlu1 %v576_v46, %s1691_s19 }
 0xa71   :  { %v579_v49 = vpop.permute.xlu1 %578 }
 0xa72   :  { %v581_v50 = vadd.f32 %v579_v49, %v571_v48 }
 0xa74   :  { %1624 = vtanh.f32 %v581_v50  ;;  %v674_v10 = vrot.slane %v581_v50, 4 }
 0xa7e   :  { %v1625_v51 = vpop.eup %1624 }
 0xa7f   :  { %584 = vrot.lane.b32.xlu0 %v1625_v51, %s1690_s2 }
 0xaf1   :  { %v585_v52 = vpop.permute.xlu0 %584 }
 0xaf2   :  { %v587_v53 = vmul.f32 %v1623_v42, %v585_v52 }
 0xaf4   :  { %v589_v54 = vrot.slane %v587_v53, 4 }
 0xaf6   :  { %590 = vrot.lane.b32.xlu1 %v589_v54, %s1691_s19 }
 0xb68   :  { %v591_v55 = vpop.permute.xlu1 %590 }
 0xb69   :  { %1455 = vmatmul.mubr.msk.f32.vlgmr.msra.gmra.mrb[10].mxu0 %vm169_vm2, %v591_v55 }
 0xb6a   :  { %1565 = vmatpush3.bf16.msra.mxu0 %v1777_v9  ;;  %1476 = vmatprep.mubr.msk.f32.mxu0 %vm1689_vm0, %v1688_v1 }
 0xb6b   :  { %1566 = vmatprep.subr.bf16.mxu0 %v1687_v0 }
 0xb6e   :  { %1568 = vmatpush3.bf16.msra.mxu0 %v1789_v14 }
 0xb6f   :  { %1575 = vmatprep.subr.bf16.mxu0 %v1687_v0 }
 0xc3c   :  { %v660_v57 = vpop.f32.mrb[10].mxu0 }
 0xc3d   :  { %v664_v58 = vadd.f32 %v660_v57, %v160_v56  ;;  %v1456_v59 = vpop.f32.mrb[11].mxu0 }
 0xc3e   :  { %v66_v59 = vsub.s32 1, %v1809_v16 }
 0xc3f   :  { %v1329_v60 = vmul.f32 -1.442695, %v664_v58 }
 0xc41   :  { %1626 = vpow2.f32 %v1329_v60  ;;  %v67_v60 = vrot.slane %v1815_v18, %v66_v59  ;;  %v1345_v59 = vld [vmem:[%s1977_s8] ss:$0 sm:$0xff] }
 0xc4b   :  { %v1627_v61 = vpop.eup %1626 }
 0xc4c   :  { %v668_v62 = vadd.f32 1.0, %v1627_v61  ;;  %v167_v61 = vadd.f32 %v1856_v7, %v67_v60 }
 0xc4e   :  { %1628 = vrcp.f32 %v668_v62  ;;  %v1340_v62 = vmul.f32 -1.442695, %v167_v61 }
 0xc58   :  { %v1629_v63 = vpop.eup %1628 }
 0xc59   :  { %v671_v2 = vmul.f32 2.0, %v1629_v63  ;;  %v676_v11 = vmul.f32 %v1629_v63, %v674_v10 }
 0xc5b   :  { %v1330_v3 = vadd.f32 -1.0, %v671_v2 }
 0xc5d   :  { %678 = vrot.lane.b32.xlu0 %v1330_v3, %s1690_s2 }
 0xccf   :  { %v679_v5 = vpop.permute.xlu0 %678 }
 0xcd0   :  { %v681_v8 = vmul.f32 %v1629_v63, %v679_v5 }
 0xcd2   :  { %683 = vrot.lane.b32.xlu1 %v681_v8, %s1691_s19 }
 0xd44   :  { %v684_v4 = vpop.permute.xlu1 %683 }
 0xd45   :  { %v686_v12 = vadd.f32 %v684_v4, %v676_v11 }
 0xd47   :  { %1630 = vtanh.f32 %v686_v12 }
 0xd51   :  { %v1631_v13 = vpop.eup %1630 }
 0xd52   :  { %689 = vrot.lane.b32.xlu0 %v1631_v13, %s1690_s2 }
 0xdc4   :  { %v690_v17 = vpop.permute.xlu0 %689 }
 0xdc5   :  { %v692_v20 = vmul.f32 %v1629_v63, %v690_v17 }
 0xdc7   :  { %694 = vrot.lane.b32.xlu1 %v692_v20, %s1691_s19 }
 0xe39   :  { %v695_v21 = vpop.permute.xlu1 %694 }
 0xe3a   :  { %1466 = vmatmul.mubr.msk.f32.vlgmr.msra.gmra.mrb[6].mxu1 %vm169_vm2, %v695_v21 }
 0xe3b   :  { %1571 = vmatpush3.bf16.msra.mxu1 %v1777_v9  ;;  %1487 = vmatprep.mubr.msk.f32.mxu1 %vm1689_vm0, %v1688_v1 }
 0xe3c   :  { %1572 = vmatprep.subr.bf16.mxu1 %v1687_v0 }
 0xe3f   :  { %1574 = vmatpush3.bf16.msra.mxu1 %v1789_v14  ;;  %v781_v14 = vrot.slane %v686_v12, 4 }
 0xe40   :  { %1581 = vmatprep.subr.bf16.mxu1 %v1687_v0 }
 0xf0d   :  { %v764_v22 = vpop.f32.mrb[6].mxu1 }
 0xf0e   :  { %v769_v23 = vrot.slane %v764_v22, 4  ;;  %v1467_v24 = vpop.f32.mrb[7].mxu1 }
 0xf10   :  { %v771_v25 = vadd.f32 %v769_v23, %v160_v56 }
 0xf12   :  { %v1332_v26 = vmul.f32 -1.442695, %v771_v25  ;;  %v1035_v25 = vld [vmem:[#allocation2] sm:$0xff] }
 0xf14   :  { %1632 = vpow2.f32 %v1332_v26  ;;  %v1036_v26 = vld [vmem:[#allocation2 + $0x8] sm:$0xff] }
 0xf1e   :  { %v1633_v27 = vpop.eup %1632 }
 0xf1f   :  { %v775_v28 = vadd.f32 1.0, %v1633_v27  ;;  %v1576_v27 = vpack.c.bf16 %v1036_v26, %v1035_v25 }
 0xf21   :  { %1634 = vrcp.f32 %v775_v28 }
 0xf2b   :  { %v1635_v29 = vpop.eup %1634 }
 0xf2c   :  { %v778_v9 = vmul.f32 2.0, %v1635_v29  ;;  %v783_v33 = vmul.f32 %v1635_v29, %v781_v14  ;;  %v1038_v14 = vld [vmem:[#allocation2 + $0x18] sm:$0xff] }
 0xf2e   :  { %v1333_v30 = vadd.f32 -1.0, %v778_v9 }
 0xf30   :  { %785 = vrot.lane.b32.xlu0 %v1333_v30, %s1690_s2 }
 0xfa2   :  { %v786_v31 = vpop.permute.xlu0 %785 }
 0xfa3   :  { %v788_v32 = vmul.f32 %v1635_v29, %v786_v31 }
 0xfa5   :  { %790 = vrot.lane.b32.xlu1 %v788_v32, %s1691_s19  ;;  %v1037_v32 = vld [vmem:[#allocation2 + $0x10] sm:$0xff] }
0x1017   :  { %v791_v34 = vpop.permute.xlu1 %790 }
0x1018   :  { %v793_v35 = vadd.f32 %v791_v34, %v783_v33  ;;  %v1579_v33 = vpack.c.bf16 %v1038_v14, %v1037_v32  ;;  %v1031_v34 = vld [vmem:[%s1973_s4] sm:$0xff] }
0x101a   :  { %1636 = vtanh.f32 %v793_v35  ;;  %v886_v53 = vrot.slane %v793_v35, 4  ;;  %v1032_v35 = vld [vmem:[%s1973_s4 + $0x8] sm:$0xff] }
0x1024   :  { %v1637_v36 = vpop.eup %1636 }
0x1025   :  { %796 = vrot.lane.b32.xlu0 %v1637_v36, %s1690_s2  ;;  %v1033_v36 = vld [vmem:[%s1973_s4 + $0x10] sm:$0xff] }
0x1097   :  { %v797_v37 = vpop.permute.xlu0 %796 }
0x1098   :  { %v799_v38 = vmul.f32 %v1635_v29, %v797_v37  ;;  %v1582_v37 = vpack.c.bf16 %v1032_v35, %v1031_v34 }
0x109a   :  { %v801_v39 = vrot.slane %v799_v38, 4  ;;  %v1034_v38 = vld [vmem:[%s1973_s4 + $0x18] sm:$0xff] }
0x109c   :  { %802 = vrot.lane.b32.xlu1 %v801_v39, %s1691_s19  ;;  %v1585_v39 = vpack.c.bf16 %v1034_v38, %v1033_v36 }
0x110e   :  { %v803_v40 = vpop.permute.xlu1 %802 }
0x110f   :  { %1477 = vmatmul.mubr.msk.f32.vlgmr.msra.gmra.mrb[12].mxu0 %vm169_vm2, %v803_v40 }
0x1110   :  { %1498 = vmatprep.mubr.msk.f32.mxu0 %vm1689_vm0, %v1688_v1  ;;  %1577 = vmatpush3.bf16.msra.mxu0 %v1576_v27 }
0x1111   :  { %1578 = vmatprep.subr.bf16.mxu0 %v1687_v0 }
0x1114   :  { %1580 = vmatpush3.bf16.msra.mxu0 %v1579_v33 }
0x1115   :  { %1587 = vmatprep.subr.bf16.mxu0 %v1687_v0 }
0x11e2   :  { %v872_v42 = vpop.f32.mrb[12].mxu0 }
0x11e3   :  { %v876_v43 = vadd.f32 %v872_v42, %v165_v41  ;;  %v1478_v44 = vpop.f32.mrb[13].mxu0 }
0x11e5   :  { %v1335_v45 = vmul.f32 -1.442695, %v876_v43 }
0x11e7   :  { %1638 = vpow2.f32 %v1335_v45 }
0x11f1   :  { %v1639_v46 = vpop.eup %1638 }
0x11f2   :  { %v880_v47 = vadd.f32 1.0, %v1639_v46 }
0x11f4   :  { %1640 = vrcp.f32 %v880_v47 }
0x11fe   :  { %v1641_v48 = vpop.eup %1640 }
0x11ff   :  { %v883_v49 = vmul.f32 2.0, %v1641_v48  ;;  %v888_v54 = vmul.f32 %v1641_v48, %v886_v53 }
0x1201   :  { %v1336_v50 = vadd.f32 -1.0, %v883_v49  ;;  %v1200_v49 = vld [vmem:[%s1976_s7] sm:$0xff] }
0x1203   :  { %890 = vrot.lane.b32.xlu0 %v1336_v50, %s1690_s2  ;;  %v1201_v50 = vld [vmem:[%s1976_s7 + $0x8] sm:$0xff] }
0x1275   :  { %v891_v51 = vpop.permute.xlu0 %890 }
0x1276   :  { %v893_v52 = vmul.f32 %v1641_v48, %v891_v51  ;;  %v1588_v51 = vpack.c.bf16 %v1201_v50, %v1200_v49 }
0x1278   :  { %895 = vrot.lane.b32.xlu1 %v893_v52, %s1691_s19  ;;  %v1202_v52 = vld [vmem:[%s1976_s7 + $0x10] sm:$0xff] }
0x12ea   :  { %v896_v19 = vpop.permute.xlu1 %895 }
0x12eb   :  { %v898_v6 = vadd.f32 %v896_v19, %v888_v54 }
0x12ed   :  { %1642 = vtanh.f32 %v898_v6  ;;  %v993_v29 = vrot.slane %v898_v6, 4 }
0x12ee   :  { %1644 = vpow2.f32 %v1340_v62 }
0x12f7   :  { %v1643_v55 = vpop.eup %1642 }
0x12f8   :  { %901 = vrot.lane.b32.xlu0 %v1643_v55, %s1690_s2  ;;  %v1645_v10 = vpop.eup %1644  ;;  %v1344_v55 = vld [vmem:[%s1975_s6] ss:$0 sm:$0xff] }
0x12f9   :  { %v1015_v11 = vadd.f32 1.0, %v1645_v10 }
0x136a   :  { %v902_v56 = vpop.permute.xlu0 %901 }
0x136b   :  { %v904_v57 = vmul.f32 %v1641_v48, %v902_v56 }
0x136d   :  { %906 = vrot.lane.b32.xlu1 %v904_v57, %s1691_s19 }
0x13df   :  { %v907_v58 = vpop.permute.xlu1 %906 }
0x13e0   :  { %1488 = vmatmul.mubr.msk.f32.vlgmr.msra.gmra.mrb[8].mxu1 %vm169_vm2, %v907_v58 }
0x13e1   :  { %1509 = vmatprep.mubr.msk.f32.mxu1 %vm1689_vm0, %v1688_v1  ;;  %1583 = vmatpush3.bf16.msra.mxu1 %v1582_v37 }
0x13e2   :  { %1584 = vmatprep.subr.bf16.mxu1 %v1687_v0 }
0x13e5   :  { %1586 = vmatpush3.bf16.msra.mxu1 %v1585_v39 }
0x14b3   :  { %v976_v63 = vpop.f32.mrb[8].mxu1 }
0x14b4   :  { %v981_v2 = vrot.slane %v976_v63, 4  ;;  %v1489_v3 = vpop.f32.mrb[9].mxu1 }
0x14b6   :  { %v983_v5 = vadd.f32 %v981_v2, %v165_v41 }
0x14b8   :  { %v1338_v8 = vmul.f32 -1.442695, %v983_v5 }
0x14ba   :  { %1646 = vpow2.f32 %v1338_v8 }
0x14bb   :  { %1648 = vrcp.f32 %v1015_v11 }
0x14c4   :  { %v1647_v4 = vpop.eup %1646 }
0x14c5   :  { %v987_v12 = vadd.f32 1.0, %v1647_v4  ;;  %v1649_v13 = vpop.eup %1648 }
0x14c6   :  { %v1018_v20 = vmul.f32 2.0, %v1649_v13 }
0x14c7   :  { %1650 = vrcp.f32 %v987_v12 }
0x14c8   :  { %v1341_v7 = vadd.f32 -1.0, %v1018_v20 }
0x14d1   :  { %v1651_v16 = vpop.eup %1650 }
0x14d2   :  { %v990_v17 = vmul.f32 2.0, %v1651_v16  ;;  %v995_v9 = vmul.f32 %v1651_v16, %v993_v29 }
0x14d4   :  { %v1339_v18 = vadd.f32 -1.0, %v990_v17 }
0x14d6   :  { %997 = vrot.lane.b32.xlu0 %v1339_v18, %s1690_s2 }
0x14da   :  { %1021 = vrot.lane.b32.xlu0 %v1341_v7, %s1690_s2 }
0x1548   :  { %v998_v21 = vpop.permute.xlu0 %997 }
0x1549   :  { %v1000_v22 = vmul.f32 %v1651_v16, %v998_v21 }
0x154b   :  { %1002 = vrot.lane.b32.xlu1 %v1000_v22, %s1691_s19 }
0x154c   :  { %v1022_v23 = vpop.permute.xlu0 %1021 }
0x154d   :  { %v1024_v24 = vmul.f32 %v1649_v13, %v1022_v23 }
0x154f   :  { %1652 = vtanh.f32 %v1024_v24 }
0x1559   :  { %v1653_v28 = vpop.eup %1652 }
0x155a   :  { %1027 = vrot.lane.b32.xlu0 %v1653_v28, %s1692_s0 }
0x15bd   :  { %v1003_v30 = vpop.permute.xlu1 %1002 }
0x15be   :  { %v1005_v31 = vadd.f32 %v1003_v30, %v995_v9 }
0x15c0   :  { %1654 = vtanh.f32 %v1005_v31 }
0x15ca   :  { %v1655_v40 = vpop.eup %1654 }
0x15cb   :  { %1008 = vrot.lane.b32.xlu1 %v1655_v40, %s1690_s2 }
0x15cc   :  { %v1028_v41 = vpop.permute.xlu0 %1027 }
0x15cd   :  { %v1030_v42 = vmul.f32 %v1649_v13, %v1028_v41  ;;  %v1285_v13 = vand.u32 127, %v60_v15 }
0x15cf   :  { %v1040_v43 = vrot.slane %v1030_v42, 4  ;;  %vm1286_vm4 = vcmp.eq.s32.totalorder %v1285_v13, 1 }
0x15d1   :  { %1041 = vrot.lane.b32.xlu1 %v1040_v43, %s1691_s19 }
0x163d   :  { %v1009_v44 = vpop.permute.xlu1 %1008 }
0x163e   :  { %v1011_v45 = vmul.f32 %v1651_v16, %v1009_v44 }
0x1640   :  { %v1116_v46 = vrot.slane %v1011_v45, 4 }
0x1642   :  { %1117 = vrot.lane.b32.xlu0 %v1116_v46, %s1691_s19 }
0x1643   :  { %v1042_v47 = vpop.permute.xlu1 %1041 }
0x1644   :  { %1499 = vmatmul.mubr.msk.f32.vlgmr.msra.gmra.mrb[14].mxu0 %vm169_vm2, %v1042_v47 }
0x1645   :  { %1520 = vmatprep.mubr.msk.f32.mxu0 %vm1689_vm0, %v1688_v1  ;;  %1589 = vmatpush3.bf16.msra.mxu0 %v1588_v51  ;;  %v1203_v1 = vld [vmem:[%s1976_s7 + $0x18] sm:$0xff] }
0x1646   :  { %1590 = vmatprep.subr.bf16.mxu0 %v1687_v0  ;;  %v1591_v53 = vpack.c.bf16 %v1203_v1, %v1202_v52 }
0x1649   :  { %1592 = vmatpush3.bf16.msra.mxu0 %v1591_v53 }
0x16b4   :  { %v1118_v48 = vpop.permute.xlu0 %1117 }
0x16b5   :  { %1510 = vmatmul.mubr.msk.f32.vlgmr.msra.gmra.mrb[10].mxu1 %vm169_vm2, %v1118_v48 }
0x1717   :  { %v1111_v54 = vpop.f32.mrb[14].mxu0 }
0x1718   :  { %v1500_v19 = vpop.f32.mrb[15].mxu0 }
0x1788   :  { %v1187_v6 = vpop.f32.mrb[10].mxu1 }
0x1789   :  { %v1188_v56 = vadd.f32 %v1187_v6, %v1111_v54  ;;  %v1511_v57 = vpop.f32.mrb[11].mxu1 }
0x178b   :  { %v1198_v0 = vadd.f32 %v1344_v55, %v1188_v56 }
0x178d   :  { %v1199_v58 = vmax.f32 %v1198_v0, 0.0 }
0x178f   :  { %1521 = vmatmul.mubr.msk.f32.vlgmr.msra.gmra.mrb[16].mxu0 %vm169_vm2, %v1199_v58 }
0x1862   :  { %v1280_v60 = vpop.f32.mrb[16].mxu0 }
0x1863   :  { %v1281_v61 = vadd.f32 %v1345_v59, %v1280_v60  ;;  %v1522_v62 = vpop.f32.mrb[17].mxu0 }
0x1865   :  { %v1290_v63 = vand.u32 2147483647, %v1281_v61  ;;  %v1287_v18 = vmax.f32 %v1281_v61, 0.0  ;;  %vm1288_vm5 = vcmp.ne.f32.partialorder %v1281_v61, %v1281_v61 }
0x1867   :  { %v1291_v2 = vsub.f32 0.0, %v1290_v63 }
0x1869   :  { %v1292_v3 = vmul.f32 1.442695, %v1291_v2 }
0x186b   :  { %1656 = vpow2.f32 %v1292_v3 }
0x1875   :  { %v1657_v5 = vpop.eup %1656 }
0x1876   :  { %v1294_v8 = vadd.f32 1.0, %v1657_v5  ;;  %v1297_v10 = vmul.f32 -0.5, %v1657_v5  ;;  %v1300_v4 = vand.u32 2147483647, %v1657_v5 }
0x1878   :  { %1658 = vlog2.f32 %v1294_v8  ;;  %v1298_v11 = vadd.f32 1.0, %v1297_v10  ;;  %vm1301_vm3 = vcmp.lt.f32.partialorder %v1300_v4, 0.0004427343 }
0x187a   :  { %v1299_v17 = vmul.f32 %v1657_v5, %v1298_v11 }
0x1882   :  { %v1659_v12 = vpop.eup %1658 }
0x1883   :  { %v1296_v16 = vmul.f32 0.6931472, %v1659_v12 }
0x1885   :  { %v1302_v20 = vsel %vm1301_vm3, %v1299_v17, %v1296_v16 }
0x1886   :  { %v1303_v7 = vadd.f32 %v1302_v20, %v1287_v18 }
0x1888   :  { %v1304_v21 = vsel %vm1288_vm5, %v1281_v61, %v1303_v7 }
0x1889   :  { %v1305_v22 = vsel %vm1286_vm4, %v1304_v21, %v1281_v61 }
0x188a   :  { %1307 = vst.msk [vmem:[%s1978_s9] sm:$0xf] %vm1306_vm6, %v1305_v22 }
0x188b   :  { %1312 = vsyncpa [#allocation3], 1 }

</bundles_post_ra>
